<compile_context>
chip_gen: v7x
topology: tpu7x:2x2x1
jax: 0.10.0
libtpu: 0.0.40
codegen_flags: <defaults>
</compile_context>

<pallas_src>
import functools
import math

import jax
import jax.numpy as jnp
from jax.experimental import pallas as pl
from jax.experimental.pallas import tpu as pltpu


def _dice_loss_kernel(pred_ref, tgt_ref, out_ref, *,
                      C, p, s_valid, rows_per_tile, steps_per_shard,
                      target_is_labels, binary_target, any_masking,
                      approx_reciprocal):
    """Grid = (batch, spatial_shard, spatial_step).

    pred_ref : (C, rows_per_tile, 128) logits block
    tgt_ref  : (C, rows_per_tile, 128) dense target block, or
               (rows_per_tile, 128) int32 label block
    out_ref  : (2, C, 128) resident accumulator; [0] = partial num, [1] = den
    """
    s = pl.program_id(1)
    j = pl.program_id(2)
    gb = s * steps_per_shard + j          # global (unclamped) row-block index

    @pl.when(j == 0)
    def _init():
        out_ref[...] = jnp.zeros_like(out_ref)

    def accumulate(masked):
        x = pred_ref[...].astype(jnp.float32)                  # (C, R, 128)
        if target_is_labels:
            labels = tgt_ref[...]                              # (R, 128) int32
            ch = jax.lax.broadcasted_iota(jnp.int32, (C,) + labels.shape, 0)
            t = (labels[None, :, :] == ch).astype(jnp.float32)
        else:
            t = tgt_ref[...].astype(jnp.float32)               # (C, R, 128)

        # Channel softmax: elementwise max/sum across the leading (untiled) C
        # axis -- pure VPU, no cross-lane/sublane reduction.
        m = jnp.max(x, axis=0, keepdims=True)                  # (1, R, 128)
        e = jnp.exp(x - m)                                     # (C, R, 128)
        se = jnp.sum(e, axis=0, keepdims=True)                 # (1, R, 128)
        # One reciprocal per position (EUP) + C multiplies (VPU), instead of
        # C EUP divides per position.
        if approx_reciprocal:
            inv = pl.reciprocal(se, approx=True)
        else:
            inv = 1.0 / se
        prob = e * inv                                         # (C, R, 128)

        if masked:
            row = jax.lax.broadcasted_iota(jnp.int32, (rows_per_tile, 128), 0)
            col = jax.lax.broadcasted_iota(jnp.int32, (rows_per_tile, 128), 1)
            gidx = (gb * rows_per_tile + row) * 128 + col
            valid = (gidx < s_valid)[None, :, :]
            # Mask both prob and t: out-of-bounds block rows contain garbage,
            # and padded lanes must not contribute to the denominator.
            prob = jnp.where(valid, prob, 0.0)
            t = jnp.where(valid, t, 0.0)

        if p == 2:
            prob_p = prob * prob          # stay on the VPU, no exp/log
        elif p == 1:
            prob_p = prob
        else:
            prob_p = prob ** p
        if binary_target:
            t_p = t                       # t in {0,1}  =>  t**p == t
        elif p == 2:
            t_p = t * t
        elif p == 1:
            t_p = t
        else:
            t_p = t ** p

        # Partial spatial reduction: reduce the sublane (row) axis, keep lanes.
        # Lane reduce + smooth + 1 - num/den happen in the wrapper on a tiny
        # (N, shards, 2, C, 128) array.
        out_ref[0] += jnp.sum(prob * t, axis=1)                # (C, 128)
        out_ref[1] += jnp.sum(prob_p + t_p, axis=1)            # (C, 128)

    if any_masking:
        block_end = (gb + 1) * (rows_per_tile * 128)
        needs = block_end > s_valid

        @pl.when(needs)
        def _masked():
            accumulate(True)

        @pl.when(jnp.logical_not(needs))
        def _unmasked():
            accumulate(False)
    else:
        accumulate(False)


def _vmem_capacity_bytes():
    try:
        return int(getattr(pltpu.get_tpu_info(), "vmem_capacity_bytes", 64 << 20))
    except Exception:
        return 64 << 20   # conservative fallback: safe on every generation


def _choose_rows_per_tile(C, total_rows, pred_isz, tgt_pos_bytes, budget, sub):
    """Largest sublane-aligned spatial tile whose working set (double-buffered
    input blocks + ~6 full-tile f32 temporaries per channel + a few per-position
    temporaries) fits the VMEM budget."""
    in_bytes = 2 * 128 * (C * pred_isz + tgt_pos_bytes)   # 2 pipeline buffers
    tmp_bytes = 128 * 4 * (6 * C + 6)                     # in-kernel f32 temps
    per_row = in_bytes + tmp_bytes
    r = max(sub, int(budget) // per_row)
    if r >= total_rows:
        return total_rows
    return max(sub, (r // sub) * sub)


def dice_loss(predict, target, smooth=1.0, p=2, weight=None, ignore_index=None,
              rows_per_tile=None, spatial_shards=None,
              assume_binary_target=False, approx_reciprocal=False):
    """Pallas equivalent of DiceLoss().forward(predict, target).

    predict: [N, C, *spatial] logits.
    target : either a dense target of the same shape as `predict` (module
             semantics), or an integer label map of shape [N, *spatial]
             (bandwidth-optimized path, equivalent to a one-hot target).
    Returns a scalar f32.
    """
    # TODO(synk): weight / ignore_index not supported (module defaults are None).
    assert weight is None and ignore_index is None

    N, C = predict.shape[0], predict.shape[1]
    S = math.prod(predict.shape[2:])
    assert S >= 1

    target_is_labels = (target.ndim == predict.ndim - 1
                        and jnp.issubdtype(target.dtype, jnp.integer))
    if target_is_labels:
        assert target.shape == (N,) + predict.shape[2:]
        binary_target = True
    else:
        assert predict.shape == target.shape, "predict & target shape do not match"
        binary_target = bool(assume_binary_target)

    total_rows = pl.cdiv(S, 128)
    s_pad = total_rows * 128
    # int32 index math in the in-kernel mask.
    assert s_pad < 2 ** 31 - (1 << 22), "spatial volume too large for int32 index math"

    pred_isz = jnp.dtype(predict.dtype).itemsize
    if target_is_labels:
        if target.dtype != jnp.int32:
            target = target.astype(jnp.int32)
        tgt_isz = 4
        tgt_pos_bytes = tgt_isz                 # bytes per spatial position
    else:
        tgt_isz = jnp.dtype(target.dtype).itemsize
        tgt_pos_bytes = C * tgt_isz

    # Sublane granularity for the row axis (packed dtypes want taller blocks).
    min_isz = min([pred_isz] + ([] if target_is_labels else [tgt_isz]))
    sub = max(8, 32 // max(1, min_isz))

    vmem_cap = _vmem_capacity_bytes()
    budget = int(0.40 * vmem_cap)     # ~51 MiB on v5e/v6e, ~25 MiB on v7x

    if rows_per_tile is None:
        rows_per_tile = _choose_rows_per_tile(C, total_rows, pred_isz,
                                              tgt_pos_bytes, budget, sub)
    else:
        rows_per_tile = min(int(rows_per_tile), total_rows)
        if rows_per_tile < total_rows:
            rows_per_tile = min(total_rows,
                                max(sub, (rows_per_tile // sub) * sub))

    num_row_blocks = pl.cdiv(total_rows, rows_per_tile)

    if spatial_shards is None:
        # v7x has 2 TensorCores; give it something to shard when N == 1.
        spatial_shards = 2 if (N == 1 and num_row_blocks >= 2) else 1
    spatial_shards = max(1, min(int(spatial_shards), num_row_blocks))
    steps_per_shard = pl.cdiv(num_row_blocks, spatial_shards)

    covered_rows = spatial_shards * steps_per_shard * rows_per_tile
    any_masking = (covered_rows * 128 != S)

    # --- Layout: NC* -> (N, C, total_rows, 128) lane-dense rows.  Only pad the
    # flat spatial axis up to the next multiple of 128 (no copy at all when
    # S % 128 == 0); ragged row-blocks are handled by a partial last Pallas
    # block + in-kernel mask instead of a full jnp.pad pass to the tile size.
    pred3 = predict.reshape(N, C, S)
    if s_pad != S:
        pred3 = jnp.pad(pred3, ((0, 0), (0, 0), (0, s_pad - S)))
    pred4 = pred3.reshape(N, C, total_rows, 128)

    # Clamp the row-block index only when the shard split over-covers the array
    # (duplicate trailing blocks are re-reads of the last block and contribute
    # zero via the mask).
    if spatial_shards * steps_per_shard > num_row_blocks:
        def _rb(s, j):
            return jnp.minimum(s * steps_per_shard + j, num_row_blocks - 1)
    else:
        def _rb(s, j):
            return s * steps_per_shard + j

    pred_spec = pl.BlockSpec((None, C, rows_per_tile, 128),
                             lambda n, s, j: (n, 0, _rb(s, j), 0))

    if target_is_labels:
        tgt2 = target.reshape(N, S)
        if s_pad != S:
            tgt2 = jnp.pad(tgt2, ((0, 0), (0, s_pad - S)))
        tgt_arr = tgt2.reshape(N, total_rows, 128)
        tgt_spec = pl.BlockSpec((None, rows_per_tile, 128),
                                lambda n, s, j: (n, _rb(s, j), 0))
    else:
        tgt3 = target.reshape(N, C, S)
        if s_pad != S:
            tgt3 = jnp.pad(tgt3, ((0, 0), (0, 0), (0, s_pad - S)))
        tgt_arr = tgt3.reshape(N, C, total_rows, 128)
        tgt_spec = pl.BlockSpec((None, C, rows_per_tile, 128),
                                lambda n, s, j: (n, 0, _rb(s, j), 0))

    out_spec = pl.BlockSpec((None, None, 2, C, 128),
                            lambda n, s, j: (n, s, 0, 0, 0))

    # Scoped-VMEM limit: generous headroom over the budgeted working set, but
    # always below physical capacity on every generation.
    vmem_limit = int(0.8 * vmem_cap)

    kernel = functools.partial(
        _dice_loss_kernel, C=C, p=p, s_valid=S, rows_per_tile=rows_per_tile,
        steps_per_shard=steps_per_shard, target_is_labels=target_is_labels,
        binary_target=binary_target, any_masking=any_masking,
        approx_reciprocal=approx_reciprocal)

    out_elems = N * spatial_shards * 2 * C * 128
    cost = pl.CostEstimate(
        flops=int(N * s_pad * C * 8),
        transcendentals=int(N * s_pad * (C + 1)),
        bytes_accessed=int(pred4.size * pred_isz
                           + tgt_arr.size * jnp.dtype(tgt_arr.dtype).itemsize
                           + out_elems * 4))

    out = pl.pallas_call(
        kernel,
        out_shape=jax.ShapeDtypeStruct((N, spatial_shards, 2, C, 128),
                                       jnp.float32),
        grid=(N, spatial_shards, steps_per_shard),
        in_specs=[pred_spec, tgt_spec],
        out_specs=out_spec,
        compiler_params=pltpu.CompilerParams(
            dimension_semantics=("parallel", "parallel", "arbitrary"),
            vmem_limit_bytes=vmem_limit),
        cost_estimate=cost,
    )(pred4, tgt_arr)

    # Tiny finalize in the wrapper: lane + shard reduce, smooth, 1 - num/den,
    # mean over batch, sum over classes / C.
    num = jnp.sum(out[:, :, 0], axis=(1, 3)) + smooth    # (N, C)
    den = jnp.sum(out[:, :, 1], axis=(1, 3)) + smooth    # (N, C)
    loss_nc = 1.0 - num / den
    return jnp.sum(loss_nc) / (N * C)


def _ref_dice_loss(predict, target, smooth=1.0, p=2):
    """Pure-JAX reference mirroring the PyTorch module exactly (f32 compute)."""
    N, C = predict.shape[0], predict.shape[1]
    prob = jax.nn.softmax(predict.astype(jnp.float32), axis=1).reshape(N, C, -1)
    tgt = target.astype(jnp.float32).reshape(N, C, -1)
    total = jnp.float32(0.0)
    for i in range(C):
        pr, tg = prob[:, i], tgt[:, i]
        num = jnp.sum(pr * tg, axis=1) + smooth
        den = jnp.sum(pr ** p + tg ** p, axis=1) + smooth
        total = total + jnp.mean(1.0 - num / den)
    return total / C


if __name__ == "__main__":
    key = jax.random.PRNGKey(0)
    k1, k2, k3, k4, k5, k6 = jax.random.split(key, 6)

    # Case 1: small NCHW input, single spatial tile, f32, dense one-hot target.
    N, C, H, W = 2, 4, 16, 16
    predict = jax.random.normal(k1, (N, C, H, W), dtype=jnp.float32)
    labels = jax.random.randint(k2, (N, H, W), 0, C)
    target = jnp.transpose(jax.nn.one_hot(labels, C, dtype=jnp.float32),
                           (0, 3, 1, 2))                       # [N, C, H, W]
    ref = _ref_dice_loss(predict, target)
    out = jax.block_until_ready(dice_loss(predict, target))
    assert jnp.allclose(out, ref, rtol=1e-4, atol=1e-5), (out, ref)

    # Case 2: ragged spatial size (40*40 = 12.5 * 128) with a small tile ->
    # partial last Pallas block + in-kernel tail mask (no tile-multiple pad).
    N2, C2, H2, W2 = 2, 4, 40, 40
    predict2 = jax.random.normal(k3, (N2, C2, H2, W2), dtype=jnp.float32)
    labels2 = jax.random.randint(k4, (N2, H2, W2), 0, C2)
    target2 = jnp.transpose(jax.nn.one_hot(labels2, C2, dtype=jnp.float32),
                            (0, 3, 1, 2))
    ref2 = _ref_dice_loss(predict2, target2)
    out2 = jax.block_until_ready(dice_loss(predict2, target2, rows_per_tile=8))
    assert jnp.allclose(out2, ref2, rtol=1e-4, atol=1e-5), (out2, ref2)

    # Case 3: integer-label target path (1 int32/position streamed instead of a
    # dense C-channel one-hot target -> biggest HBM-traffic saver).
    out3 = jax.block_until_ready(dice_loss(predict, labels.astype(jnp.int32)))
    assert jnp.allclose(out3, ref, rtol=1e-4, atol=1e-5), (out3, ref)

    # Case 4: N == 1 with 2-way spatial sharding (v7x dual-TensorCore path) and
    # an uneven block split (exercises the clamped index map + masked tail).
    N4, C4, H4, W4 = 1, 3, 48, 48
    predict4 = jax.random.normal(k5, (N4, C4, H4, W4), dtype=jnp.float32)
    labels4 = jax.random.randint(k6, (N4, H4, W4), 0, C4)
    target4 = jnp.transpose(jax.nn.one_hot(labels4, C4, dtype=jnp.float32),
                            (0, 3, 1, 2))
    ref4 = _ref_dice_loss(predict4, target4)
    out4 = jax.block_until_ready(
        dice_loss(predict4, target4, rows_per_tile=8, spatial_shards=2))
    assert jnp.allclose(out4, ref4, rtol=1e-4, atol=1e-5), (out4, ref4)

    # Case 5: bf16 inputs straight from a bf16 producer (no wrapper-side astype;
    # kernel computes in f32).  One-hot targets are exact in bf16, so t**p == t.
    ref5 = _ref_dice_loss(predict.astype(jnp.bfloat16).astype(jnp.float32),
                          target.astype(jnp.bfloat16).astype(jnp.float32))
    out5 = jax.block_until_ready(
        dice_loss(predict.astype(jnp.bfloat16), target.astype(jnp.bfloat16),
                  assume_binary_target=True))
    assert jnp.allclose(out5, ref5, rtol=1e-4, atol=1e-4), (out5, ref5)

    print("KERNEL_OK")
</pallas_src>

<mosaic_0001>
module attributes {stable_mosaic.version = 11 : i64} {
  func.func @_dice_loss_kernel(%arg0: i32, %arg1: i32, %arg2: i32, %arg3: memref<1x4x2x128xf32, #tpu.memory_space<vmem>>, %arg4: memref<1x4x2x128xf32, #tpu.memory_space<vmem>>, %arg5: memref<1x1x2x4x128xf32, #tpu.memory_space<vmem>>) attributes {dimension_semantics = [#tpu.dimension_semantics<parallel>, #tpu.dimension_semantics<parallel>, #tpu.dimension_semantics<arbitrary>], iteration_bounds = array<i64: 2, 1, 1>, scalar_prefetch = 0 : i64, scratch_operands = 0 : i64, tpu.core_type = #tpu.core_type<tc>, window_params = [{transform_indices = @transform_0, window_bounds = array<i64: 1, 4, 2, 128>}, {transform_indices = @transform_1, window_bounds = array<i64: 1, 4, 2, 128>}, {transform_indices = @transform_2, window_bounds = array<i64: 1, 1, 2, 4, 128>}]} {
    %c0_i32 = arith.constant 0 : i32
    %0 = arith.cmpi eq, %arg2, %c0_i32 : i32
    %1 = arith.extui %0 : i1 to i32
    %c0_i32_0 = arith.constant 0 : i32
    %2 = arith.cmpi ne, %1, %c0_i32_0 : i32
    scf.if %2 {
      %cst_31 = arith.constant 0.000000e+00 : f32
      %36 = vector.broadcast %cst_31 : f32 to vector<2x4x128xf32>
      %c0_32 = arith.constant 0 : index
      %c0_33 = arith.constant 0 : index
      %c0_34 = arith.constant 0 : index
      %c0_35 = arith.constant 0 : index
      %c0_36 = arith.constant 0 : index
      %37 = vector.load %arg5[%c0_32, %c0_33, %c0_34, %c0_35, %c0_36] : memref<1x1x2x4x128xf32, #tpu.memory_space<vmem>>, vector<1x1x2x4x128xf32>
      %38 = vector.shape_cast %37 : vector<1x1x2x4x128xf32> to vector<2x4x128xf32>
      %39 = vector.shape_cast %36 : vector<2x4x128xf32> to vector<1x1x2x4x128xf32>
      tpu.vector_store %arg5[%c0_32, %c0_33, %c0_34, %c0_35, %c0_36], %39 {strides = array<i32>} : memref<1x1x2x4x128xf32, #tpu.memory_space<vmem>>, vector<1x1x2x4x128xf32>,
    } else {
    }
    %c0 = arith.constant 0 : index
    %c0_1 = arith.constant 0 : index
    %c0_2 = arith.constant 0 : index
    %c0_3 = arith.constant 0 : index
    %3 = vector.load %arg3[%c0, %c0_1, %c0_2, %c0_3] : memref<1x4x2x128xf32, #tpu.memory_space<vmem>>, vector<1x4x2x128xf32>
    %4 = vector.shape_cast %3 : vector<1x4x2x128xf32> to vector<4x2x128xf32>
    %c0_4 = arith.constant 0 : index
    %c0_5 = arith.constant 0 : index
    %c0_6 = arith.constant 0 : index
    %c0_7 = arith.constant 0 : index
    %5 = vector.load %arg4[%c0_4, %c0_5, %c0_6, %c0_7] : memref<1x4x2x128xf32, #tpu.memory_space<vmem>>, vector<1x4x2x128xf32>
    %6 = vector.shape_cast %5 : vector<1x4x2x128xf32> to vector<4x2x128xf32>
    %cst = arith.constant dense<0xFF800000> : vector<2x128xf32>
    %7 = vector.multi_reduction <maximumf>, %4, %cst [0] : vector<4x2x128xf32> to vector<2x128xf32>
    %8 = vector.shape_cast %7 : vector<2x128xf32> to vector<1x2x128xf32>
    %9 = vector.broadcast %8 : vector<1x2x128xf32> to vector<4x2x128xf32>
    %10 = arith.subf %4, %9 : vector<4x2x128xf32>
    %11 = math.exp %10 : vector<4x2x128xf32>
    %cst_8 = arith.constant dense<0.000000e+00> : vector<2x128xf32>
    %12 = vector.multi_reduction <add>, %11, %cst_8 [0] : vector<4x2x128xf32> to vector<2x128xf32>
    %13 = vector.shape_cast %12 : vector<2x128xf32> to vector<1x2x128xf32>
    %cst_9 = arith.constant 1.000000e+00 : f32
    %14 = vector.broadcast %cst_9 : f32 to vector<1x2x128xf32>
    %15 = arith.divf %14, %13 : vector<1x2x128xf32>
    %16 = vector.broadcast %15 : vector<1x2x128xf32> to vector<4x2x128xf32>
    %17 = arith.mulf %11, %16 : vector<4x2x128xf32>
    %18 = arith.mulf %17, %17 : vector<4x2x128xf32>
    %19 = arith.mulf %6, %6 : vector<4x2x128xf32>
    %c0_10 = arith.constant 0 : index
    %c0_11 = arith.constant 0 : index
    %c0_12 = arith.constant 0 : index
    %c0_13 = arith.constant 0 : index
    %c0_14 = arith.constant 0 : index
    %20 = vector.load %arg5[%c0_10, %c0_11, %c0_12, %c0_13, %c0_14] : memref<1x1x2x4x128xf32, #tpu.memory_space<vmem>>, vector<1x1x1x4x128xf32>
    %21 = vector.shape_cast %20 : vector<1x1x1x4x128xf32> to vector<4x128xf32>
    %22 = arith.mulf %17, %6 : vector<4x2x128xf32>
    %cst_15 = arith.constant dense<0.000000e+00> : vector<4x128xf32>
    %23 = vector.multi_reduction <add>, %22, %cst_15 [1] : vector<4x2x128xf32> to vector<4x128xf32>
    %24 = arith.addf %21, %23 : vector<4x128xf32>
    %c0_16 = arith.constant 0 : index
    %c0_17 = arith.constant 0 : index
    %c0_18 = arith.constant 0 : index
    %c0_19 = arith.constant 0 : index
    %c0_20 = arith.constant 0 : index
    %25 = vector.load %arg5[%c0_16, %c0_17, %c0_18, %c0_19, %c0_20] : memref<1x1x2x4x128xf32, #tpu.memory_space<vmem>>, vector<1x1x1x4x128xf32>
    %26 = vector.shape_cast %25 : vector<1x1x1x4x128xf32> to vector<4x128xf32>
    %27 = vector.shape_cast %24 : vector<4x128xf32> to vector<1x1x1x4x128xf32>
    tpu.vector_store %arg5[%c0_16, %c0_17, %c0_18, %c0_19, %c0_20], %27 {strides = array<i32>} : memref<1x1x2x4x128xf32, #tpu.memory_space<vmem>>, vector<1x1x1x4x128xf32>,
    %c0_21 = arith.constant 0 : index
    %c0_22 = arith.constant 0 : index
    %c1 = arith.constant 1 : index
    %c0_23 = arith.constant 0 : index
    %c0_24 = arith.constant 0 : index
    %28 = vector.load %arg5[%c0_21, %c0_22, %c1, %c0_23, %c0_24] : memref<1x1x2x4x128xf32, #tpu.memory_space<vmem>>, vector<1x1x1x4x128xf32>
    %29 = vector.shape_cast %28 : vector<1x1x1x4x128xf32> to vector<4x128xf32>
    %30 = arith.addf %18, %19 : vector<4x2x128xf32>
    %cst_25 = arith.constant dense<0.000000e+00> : vector<4x128xf32>
    %31 = vector.multi_reduction <add>, %30, %cst_25 [1] : vector<4x2x128xf32> to vector<4x128xf32>
    %32 = arith.addf %29, %31 : vector<4x128xf32>
    %c0_26 = arith.constant 0 : index
    %c0_27 = arith.constant 0 : index
    %c1_28 = arith.constant 1 : index
    %c0_29 = arith.constant 0 : index
    %c0_30 = arith.constant 0 : index
    %33 = vector.load %arg5[%c0_26, %c0_27, %c1_28, %c0_29, %c0_30] : memref<1x1x2x4x128xf32, #tpu.memory_space<vmem>>, vector<1x1x1x4x128xf32>
    %34 = vector.shape_cast %33 : vector<1x1x1x4x128xf32> to vector<4x128xf32>
    %35 = vector.shape_cast %32 : vector<4x128xf32> to vector<1x1x1x4x128xf32>
    tpu.vector_store %arg5[%c0_26, %c0_27, %c1_28, %c0_29, %c0_30], %35 {strides = array<i32>} : memref<1x1x2x4x128xf32, #tpu.memory_space<vmem>>, vector<1x1x1x4x128xf32>,
    return
  }
  func.func @transform_0(%arg0: i32, %arg1: i32, %arg2: i32) -> (i32, i32, i32, i32) {
    %c1_i32 = arith.constant 1 : i32
    %0 = arith.muli %arg1, %c1_i32 : i32
    %1 = arith.addi %0, %arg2 : i32
    %c0_i32 = arith.constant 0 : i32
    %c0_i32_0 = arith.constant 0 : i32
    %c0_i32_1 = arith.constant 0 : i32
    return %arg0, %c0_i32, %1, %c0_i32_0 : i32, i32, i32, i32
  }
  func.func @transform_1(%arg0: i32, %arg1: i32, %arg2: i32) -> (i32, i32, i32, i32) {
    %c1_i32 = arith.constant 1 : i32
    %0 = arith.muli %arg1, %c1_i32 : i32
    %1 = arith.addi %0, %arg2 : i32
    %c0_i32 = arith.constant 0 : i32
    %c0_i32_0 = arith.constant 0 : i32
    %c0_i32_1 = arith.constant 0 : i32
    return %arg0, %c0_i32, %1, %c0_i32_0 : i32, i32, i32, i32
  }
  func.func @transform_2(%arg0: i32, %arg1: i32, %arg2: i32) -> (i32, i32, i32, i32, i32) {
    %c0_i32 = arith.constant 0 : i32
    %c0_i32_0 = arith.constant 0 : i32
    %c0_i32_1 = arith.constant 0 : i32
    %c0_i32_2 = arith.constant 0 : i32
    return %arg0, %arg1, %c0_i32, %c0_i32_0, %c0_i32_1 : i32, i32, i32, i32, i32
  }
}

</mosaic_0001>

<bundles_post_ra>
// kernel: tpu_custom_call.1
= control target key start
LH: loop header
LB: loop body
LE: loop exit
PB: predicated region body
PF: predicated region fallthrough
CT: control target
= control target key end

     0   :  { %7 = vsyncpa [#allocation3], 0  ;;  %s1064_s0 = inlined_call_operand.hbm [shape: f32[2,4,2,128], index: 0, kind: input, shape index: {}]   ;;  %s1065_s1 = inlined_call_operand.hbm [shape: f32[2,4,2,128], index: 1, kind: input, shape index: {}]   ;;  %s1066_s2 = inlined_call_operand.hbm [shape: f32[2,1,2,4,128], index: 2, kind: output, shape index: {}]  }
   0x1   :  { %9 = vsyncpa [#allocation3 + $0x1], 0 }
   0x2   :  { %10 = vsyncpa [#allocation6], 0 }
   0x3   :  { %12 = vsyncpa [#allocation6 + $0x1], 0 }
   0x4   :  { %13 = vsyncpa [#allocation4], 0 }
   0x5   :  { %15 = vsyncpa [#allocation4 + $0x1], 0  ;;  %s791_s9 = smov 0   ;;  %s793_s10 = smov 0  }
   0x6   :  { %s795_s11 = smov 0   ;;  %s797_s12 = smov 0  }
   0x7   :  { %s799_s13 = smov 0   ;;  %s801_s14 = smov 0  }
   0x8 LB: > { %s514_s15 = sadd.s32 4294967295, %s766_s14   ;;  %s515_s16 = sadd.s32 4294967294, %s766_s14   ;;  %s766_s14 = sphi %s801_s14, %s21_s14   ;;  %s762_s13 = sphi %s799_s13, %s1084_s13   ;;  %s758_s12 = sphi %s797_s12, %s1083_s12   ;;  %s754_s11 = sphi %s795_s11, %s1082_s11   ;;  %s750_s10 = sphi %s793_s10, %s1081_s10   ;;  %s746_s9 = sphi %s791_s9, %s1080_s9  }
   0x9   : > { %s40_s17 = sadd.s32 1, %s762_s13  ;;  %s51_s18 = sadd.s32 1, %s754_s11 }
   0xa   : > { %p42_p0 = scmp.ge.s32.totalorder %s40_s17, 2  ;;  %p58_p1 = scmp.ne.s32.totalorder %s754_s11, %s750_s10 }
   0xb   : > { %p59_p2 = scmp.eq.s32.totalorder %s766_s14, 0  ;;  %p64_p3 = scmp.ne.s32.totalorder %s750_s10, %s746_s9 }
   0xc   : > { %s1086_s17 = smov (%p42_p0, %s40_s17), 0  ;;  %p65_p5 = scmp.eq.s32.totalorder %s514_s15, 0 }
   0xd   : > { %p832_p4 = por %p59_p2, %p58_p1  ;;  %s46_s20 = ssub.s32 %s762_s13, %s1086_s17 }
   0xe   : > { %p120_p6 = scmp.eq.s32.totalorder %s514_s15, 1  ;;  %p49_p7 = scmp.eq.s32.totalorder %s46_s20, 0 }
   0xf   : > { %p838_p8 = por %p65_p5, %p64_p3  ;;  %p126_p10 = scmp.eq.s32.totalorder %s515_s16, 1 }
  0x10   : > { %p842_p9 = por %p120_p6, %p58_p1  ;;  %p555_p13 = scmp.lt.s32.totalorder %s766_s14, 2 }
  0x11   : > { %s1070_s21 = scalar_select %p838_p8, 1, 0 }
  0x12   : > { %s1071_s22 = scalar_select %p842_p9, 1, 0 }
  0x13   : > { %s847_s23 = scalar_select %p49_p7, %s754_s11, %s51_s18  }
  0x14   : > { %p849_p11 = por %p126_p10, %p64_p3  ;;  %s856_s25 = sand.u32 1, %s754_s11  }
  0x15   : > { %s518_s26 = sshll.u32 %s856_s25, 3  ;;  %s535_s27 = sshll.u32 %s762_s13, 7 }
  0x16   : > { %s1072_s24 = scalar_select %p849_p11, 1, 0 }
  0x17   : > { %s865_s30 = scalar_lea.hbm %s1064_s0, %s535_s27  ;;  %s150_s3 = scalar_lea.vmem [#allocation2], %s518_s26 }
  0x18   : > { %s159_s4 = sshll.u32 %s150_s3, 4  ;;  %p873_p0 = pnand %p555_p13, %p832_p4  ;;  %s869_s4 = int_to_ptr.vmem [resolvable:$true] %s159_s4 }
  0x19   : > { %s147_s6 = scalar_lea.sflag [#allocation3], %s856_s25  ;;  %s620_s7 = scalar_lea.hbm %s865_s30, 128 }
  0x1a   : > { %p621_p2 = scmp.ne.s32.totalorder %s865_s30, %s620_s7  ;;  %p622_p3 = pneg %p873_p0 }
  0x1b   : > { %s625_s16 = scalar_lea.hbm %s1064_s0, 256  ;;  %p626_p4 = scmp.lt.u32.totalorder %s865_s30, %s1064_s0 }
  0x1c   : > { %p623_p5 = pnand %p622_p3, %p621_p2  ;;  %p627_p7 = scmp.lt.u32.totalorder %s625_s16, %s620_s7 }
  0x1d   : > { %p629_p13 = scmp.lt.u32.totalorder %s620_s7, %s865_s30 }
  0x1e   : > { %p624_p6 = pneg %p623_p5  ;;  %p628_p10 = por %p627_p7, %p626_p4 }
  0x20   : > { %p630_p12 = por %p629_p13, %p628_p10 }
  0x22   : > { %p631_p1 = pnand %p630_p12, %p624_p6 }
  0x24   : > { %634 = shalt.err (!%p631_p1)
}
  0x25   : > { %s635_s20 = scalar_lea.vmem %s869_s4, 128  ;;  %s768_s28 = smov [#allocation2]  }
  0x26   : > { %p636_p2 = scmp.ne.s32.totalorder %s869_s4, %s635_s20  ;;  %s640_s29 = sshll.u32 %s768_s28, 4  ;;  %s641_s29 = int_to_ptr.vmem [resolvable:$false] %s640_s29 }
  0x27   : > { %s642_s3 = scalar_lea.vmem %s641_s29, 256  ;;  %p643_p9 = scmp.lt.s32.totalorder %s869_s4, %s641_s29 }
  0x28   : > { %p638_p5 = pnand %p636_p2, %p622_p3  ;;  %p644_p4 = scmp.lt.s32.totalorder %s642_s3, %s635_s20 }
  0x2a   : > { %p639_p11 = pneg %p638_p5  ;;  %p645_p7 = por %p644_p4, %p643_p9 }
  0x2c   : > { %p646_p10 = pnand %p645_p7, %p639_p11 }
  0x2e   : > { %649 = shalt.err (!%p646_p10)
}
  0x2f   : > { %s769_s7 = smov 32   ;;  %s770_s8 = smov 2  }
  0x30   : > { %547 = dma.hbm_to_vmem [thread:$0]  (!%p873_p0), %s865_s30, 128, %s869_s4, %s147_s6, %s769_s7, %s769_s7, %s770_s8  }
  0x31   : > { %p190_p9 = scmp.lt.s32.totalorder %s766_s14, 3  ;;  %s915_s18 = scalar_lea.hbm %s1065_s1, %s535_s27 }
  0x32   : > { %p1074_p11 = scmp.ge.s32.totalorder %s766_s14, 1  ;;  %s173_s20 = scalar_lea.vmem [#allocation5], %s518_s26 }
  0x33   : > { %s182_s28 = sshll.u32 %s173_s20, 4  ;;  %s170_s30 = scalar_lea.sflag [#allocation6], %s856_s25  ;;  %s925_s28 = int_to_ptr.vmem [resolvable:$true] %s182_s28 }
  0x34   : > { %p919_p12 = pnand %p1074_p11, %p190_p9  ;;  %s650_s4 = scalar_lea.hbm %s915_s18, 128 }
  0x35   : > { %p651_p1 = scmp.ne.s32.totalorder %s915_s18, %s650_s4  ;;  %s655_s29 = scalar_lea.hbm %s1065_s1, 256 }
  0x36   : > { %p656_p2 = scmp.lt.u32.totalorder %s915_s18, %s1065_s1  ;;  %p657_p5 = scmp.lt.u32.totalorder %s655_s29, %s650_s4 }
  0x37   : > { %p653_p6 = pnand %p651_p1, %p622_p3  ;;  %p659_p7 = scmp.lt.u32.totalorder %s650_s4, %s915_s18 }
  0x38   : > { %p658_p4 = por %p657_p5, %p656_p2 }
  0x39   : > { %p654_p13 = pneg %p653_p6 }
  0x3a   : > { %p660_p10 = por %p659_p7, %p658_p4 }
  0x3c   : > { %p661_p9 = pnand %p660_p10, %p654_p13 }
  0x3e   : > { %664 = shalt.err (!%p661_p9)
}
  0x3f   : > { %s665_s26 = scalar_lea.vmem %s925_s28, 128  ;;  %s771_s16 = smov [#allocation5]  }
  0x40   : > { %p666_p11 = scmp.ne.s32.totalorder %s925_s28, %s665_s26  ;;  %s670_s20 = sshll.u32 %s771_s16, 4  ;;  %s671_s20 = int_to_ptr.vmem [resolvable:$false] %s670_s20 }
  0x41   : > { %s672_s27 = scalar_lea.vmem %s671_s20, 256  ;;  %p673_p8 = scmp.lt.s32.totalorder %s925_s28, %s671_s20 }
  0x42   : > { %p668_p1 = pnand %p666_p11, %p622_p3  ;;  %p674_p2 = scmp.lt.s32.totalorder %s672_s27, %s665_s26 }
  0x44   : > { %p669_p6 = pneg %p668_p1  ;;  %p675_p5 = por %p674_p2, %p673_p8 }
  0x46   : > { %p676_p4 = pnand %p675_p5, %p669_p6 }
  0x48   : > { %679 = shalt.err (!%p676_p4)
}
  0x49   : > { %550 = dma.hbm_to_vmem [thread:$0]  (!%p873_p0), %s915_s18, 128, %s925_s28, %s170_s30, %s769_s7, %s769_s7, %s770_s8  }
  0x4a   : > { %194 = sbr.rel (%p919_p12) target bundleno = 168 (0xa8), region = 28  ;;  %s959_s4 = sand.u32 (!%p919_p12), 1, %s750_s10  }
  0x4b   : > { %s525_s6 = sshll.u32 (!%p919_p12), %s959_s4, 3  ;;  %s197_s29 = scalar_lea.sflag (!%p919_p12), [#allocation3], %s959_s4 }
  0x4c   : > { %s200_s5 = scalar_lea.vmem (!%p919_p12), [#allocation2], %s525_s6  ;;  %p1076_p8 = scmp.ne.s32.totalorder (!%p919_p12), %s1070_s21, 0 }
  0x51   : > { %733 = dma.done.wait (%p1076_p8), %s197_s29, 128  }
  0x52   : > { %735 = vsyncadd (%p1076_p8), %s197_s29, 4294967168  ;;  %s206_s25 = scalar_lea.sflag [#allocation6], %s959_s4  ;;  %s968_s7 = scalar_lea.vmem [#allocation5], %s525_s6 }
  0x53   : > { %737 = dma.done.wait (%p1076_p8), %s206_s25, 128  }
  0x54   : > { %739 = vsyncadd (%p1076_p8), %s206_s25, 4294967168  ;;  %s974_s8 = scalar_lea.vmem [#allocation7], %s525_s6  ;;  %v772_v0 = vmov 0.0   ;;  %vm251_vm0 = vcmask 1041408   ;;  %v243_v1 = vld [vmem:[%s200_s5] sm:$0x3] }
  0x55   : > { %241 = vst [vmem:[%s974_s8] sm:$0xf] %v772_v0  ;;  %242 = vst [vmem:[%s974_s8 + $0x4] sm:$0xf] %v772_v0  ;;  %v244_v2 = vld [vmem:[%s200_s5 + $0x2] sm:$0x3]  ;;  %v252_v5 = vsel %vm251_vm0, %v243_v1, -inf }
  0x56   : > { %v245_v3 = vld [vmem:[%s200_s5 + $0x4] sm:$0x3]  ;;  %v246_v4 = vld [vmem:[%s200_s5 + $0x6] sm:$0x3]  ;;  %v253_v6 = vsel %vm251_vm0, %v244_v2, -inf  ;;  %vm329_vm1 = vcmask 1041409  }
  0x57   : > { %v254_v7 = vsel %vm251_vm0, %v245_v3, -inf  ;;  %v255_v8 = vsel %vm251_vm0, %v246_v4, -inf  ;;  %v256_v9 = vmax.f32 %v252_v5, %v253_v6  ;;  %v247_v31 = vld [vmem:[%s968_s7] sm:$0x3]  ;;  %v248_v32 = vld [vmem:[%s968_s7 + $0x2] sm:$0x3] }
  0x58   : > { %v257_v10 = vmax.f32 %v254_v7, %v255_v8  ;;  %v249_v33 = vld [vmem:[%s968_s7 + $0x4] sm:$0x3]  ;;  %v250_v34 = vld [vmem:[%s968_s7 + $0x6] sm:$0x3]  ;;  %v288_v40 = vmul.f32 %v247_v31, %v247_v31  ;;  %v289_v41 = vmul.f32 %v248_v32, %v248_v32  ;;  %vm331_vm2 = vcmask 1042434   ;;  %s537_s21 = sshll.u32 %s758_s12, 7 }
  0x59   : > { %v290_v42 = vmul.f32 %v249_v33, %v249_v33  ;;  %v291_v43 = vmul.f32 %v250_v34, %v250_v34  ;;  %vm333_vm3 = vcmask 1043459   ;;  %s398_s18 = sshll.u32 %s974_s8, 4  ;;  %s1012_s30 = scalar_lea.hbm %s1066_s2, %s537_s21  ;;  %s1014_s18 = int_to_ptr.vmem [resolvable:$true] %s398_s18 }
  0x5a   : > { %v258_v11 = vmax.f32 %v256_v9, %v257_v10  ;;  %s383_s12 = scalar_lea.sflag [#allocation4], %s959_s4  ;;  %s680_s3 = scalar_lea.vmem %s1014_s18, 128 }
  0x5b   : > { %p681_p0 = scmp.ne.s32.totalorder %s1014_s18, %s680_s3  ;;  %p1077_p3 = scmp.ne.s32.totalorder %s1071_s22, 0 }
  0x5c   : > { %v259_v12 = vsub.f32 %v243_v1, %v258_v11  ;;  %v260_v13 = vsub.f32 %v244_v2, %v258_v11  ;;  %v261_v14 = vsub.f32 %v245_v3, %v258_v11  ;;  %v262_v15 = vsub.f32 %v246_v4, %v258_v11  ;;  %s773_s15 = smov [#allocation7]  }
  0x5d   : > { %p682_p12 = pnand %p681_p0, %p1077_p3  ;;  %s684_s26 = sshll.u32 %s773_s15, 4  ;;  %s685_s26 = int_to_ptr.vmem [resolvable:$false] %s684_s26 }
  0x5e   : > { %v263_v16 = vmul.f32 1.442695, %v259_v12  ;;  %v265_v17 = vmul.f32 1.442695, %v260_v13  ;;  %v267_v18 = vmul.f32 1.442695, %v261_v14  ;;  %p687_p7 = scmp.lt.s32.totalorder %s1014_s18, %s685_s26 }
  0x5f   : > { %v269_v19 = vmul.f32 1.442695, %v262_v15  ;;  %p683_p13 = pneg %p682_p12  ;;  %s686_s16 = scalar_lea.vmem %s685_s26, 256 }
  0x60   : > { %610 = vpow2.f32 %v263_v16  ;;  %p688_p10 = scmp.lt.s32.totalorder %s686_s16, %s680_s3 }
  0x61   : > { %612 = vpow2.f32 %v265_v17 }
  0x62   : > { %614 = vpow2.f32 %v267_v18  ;;  %p689_p9 = por %p688_p10, %p687_p7 }
  0x63   : > { %616 = vpow2.f32 %v269_v19 }
  0x64   : > { %p690_p11 = pnand %p689_p9, %p683_p13 }
  0x6a   : > { %v611_v20 = vpop.eup %610 }
  0x6b   : > { %v613_v21 = vpop.eup %612  ;;  %v271_v22 = vsel %vm251_vm0, %v611_v20, 0.0 }
  0x6c   : > { %v615_v23 = vpop.eup %614  ;;  %v272_v24 = vsel %vm251_vm0, %v613_v21, 0.0 }
  0x6d   : > { %v617_v25 = vpop.eup %616  ;;  %v273_v26 = vadd.f32 %v272_v24, %v271_v22  ;;  %v274_v27 = vsel %vm251_vm0, %v615_v23, 0.0 }
  0x6e   : > { %v276_v28 = vsel %vm251_vm0, %v617_v25, 0.0 }
  0x6f   : > { %v275_v29 = vadd.f32 %v274_v27, %v273_v26 }
  0x71   : > { %v277_v30 = vadd.f32 %v276_v28, %v275_v29 }
  0x73   : > { %618 = vrcp.f32 %v277_v30 }
  0x7d   : > { %v619_v35 = vpop.eup %618 }
  0x7e   : > { %v280_v36 = vmul.f32 %v619_v35, %v611_v20  ;;  %v281_v37 = vmul.f32 %v619_v35, %v613_v21  ;;  %v282_v38 = vmul.f32 %v619_v35, %v615_v23  ;;  %v283_v39 = vmul.f32 %v619_v35, %v617_v25 }
  0x80   : > { %v293_v44 = vmul.f32 %v280_v36, %v247_v31  ;;  %v294_v45 = vmul.f32 %v281_v37, %v248_v32  ;;  %v295_v46 = vmul.f32 %v282_v38, %v249_v33  ;;  %v296_v47 = vmul.f32 %v283_v39, %v250_v34 }
  0x81   : > { %v284_v48 = vmul.f32 %v280_v36, %v280_v36  ;;  %v285_v49 = vmul.f32 %v281_v37, %v281_v37  ;;  %v286_v50 = vmul.f32 %v282_v38, %v282_v38  ;;  %v287_v51 = vmul.f32 %v283_v39, %v283_v39 }
  0x82   : > { %v297_v52 = vsel %vm251_vm0, %v293_v44, 0.0  ;;  %v304_v53 = vsel %vm251_vm0, %v294_v45, 0.0  ;;  %v311_v54 = vsel %vm251_vm0, %v295_v46, 0.0  ;;  %v318_v55 = vsel %vm251_vm0, %v296_v47, 0.0 }
  0x83   : > { %v298_v56 = vrot.slane %v297_v52, 4  ;;  %v305_v57 = vrot.slane %v304_v53, 4  ;;  %v312_v58 = vrot.slane %v311_v54, 4  ;;  %v319_v59 = vrot.slane %v318_v55, 4 }
  0x84   : > { %v340_v60 = vadd.f32 %v288_v40, %v284_v48  ;;  %v341_v61 = vadd.f32 %v289_v41, %v285_v49  ;;  %v342_v62 = vadd.f32 %v290_v42, %v286_v50  ;;  %v343_v63 = vadd.f32 %v291_v43, %v287_v51  ;;  %v292_v40 = vld [vmem:[%s974_s8] sm:$0xf] }
  0x85   : > { %v299_v0 = vadd.f32 %v298_v56, %v297_v52  ;;  %v306_v1 = vadd.f32 %v305_v57, %v304_v53  ;;  %v313_v2 = vadd.f32 %v312_v58, %v311_v54  ;;  %v320_v3 = vadd.f32 %v319_v59, %v318_v55  ;;  %v528_v53 = vld [vmem:[%s974_s8 + $0x4] sm:$0xf] }
  0x86   : > { %v344_v4 = vsel %vm251_vm0, %v340_v60, 0.0  ;;  %v351_v5 = vsel %vm251_vm0, %v341_v61, 0.0  ;;  %v358_v6 = vsel %vm251_vm0, %v342_v62, 0.0  ;;  %v365_v7 = vsel %vm251_vm0, %v343_v63, 0.0 }
  0x87   : > { %v300_v8 = vrot.slane %v299_v0, 2  ;;  %v307_v9 = vrot.slane %v306_v1, 2  ;;  %v314_v10 = vrot.slane %v313_v2, 2  ;;  %v321_v11 = vrot.slane %v320_v3, 2 }
  0x88   : > { %v345_v12 = vrot.slane %v344_v4, 4  ;;  %v352_v13 = vrot.slane %v351_v5, 4  ;;  %v359_v14 = vrot.slane %v358_v6, 4  ;;  %v366_v15 = vrot.slane %v365_v7, 4 }
  0x89   : > { %v301_v16 = vadd.f32 %v300_v8, %v299_v0  ;;  %v308_v17 = vadd.f32 %v307_v9, %v306_v1  ;;  %v315_v18 = vadd.f32 %v314_v10, %v313_v2  ;;  %v322_v19 = vadd.f32 %v321_v11, %v320_v3 }
  0x8a   : > { %v346_v20 = vadd.f32 %v345_v12, %v344_v4  ;;  %v353_v21 = vadd.f32 %v352_v13, %v351_v5  ;;  %v360_v22 = vadd.f32 %v359_v14, %v358_v6  ;;  %v367_v23 = vadd.f32 %v366_v15, %v365_v7 }
  0x8b   : > { %v302_v24 = vrot.slane %v301_v16, 1  ;;  %v309_v25 = vrot.slane %v308_v17, 1  ;;  %v316_v26 = vrot.slane %v315_v18, 1  ;;  %v323_v27 = vrot.slane %v322_v19, 1 }
  0x8c   : > { %v347_v28 = vrot.slane %v346_v20, 2  ;;  %v354_v29 = vrot.slane %v353_v21, 2  ;;  %v361_v30 = vrot.slane %v360_v22, 2  ;;  %v368_v31 = vrot.slane %v367_v23, 2 }
  0x8d   : > { %v303_v32 = vadd.f32 %v302_v24, %v301_v16  ;;  %v310_v33 = vadd.f32 %v309_v25, %v308_v17  ;;  %v317_v34 = vadd.f32 %v316_v26, %v315_v18  ;;  %v324_v35 = vadd.f32 %v323_v27, %v322_v19 }
  0x8e   : > { %v348_v36 = vadd.f32 %v347_v28, %v346_v20  ;;  %v355_v37 = vadd.f32 %v354_v29, %v353_v21  ;;  %v362_v38 = vadd.f32 %v361_v30, %v360_v22  ;;  %v369_v39 = vadd.f32 %v368_v31, %v367_v23 }
  0x8f   : > { %v330_v41 = vsel %vm329_vm1, %v310_v33, %v303_v32 }
  0x90   : > { %v332_v42 = vsel %vm331_vm2, %v317_v34, %v330_v41  ;;  %v349_v43 = vrot.slane %v348_v36, 1  ;;  %v356_v44 = vrot.slane %v355_v37, 1  ;;  %v363_v45 = vrot.slane %v362_v38, 1 }
  0x91   : > { %v334_v46 = vsel %vm333_vm3, %v324_v35, %v332_v42  ;;  %v370_v47 = vrot.slane %v369_v39, 1 }
  0x92   : > { %v336_v48 = vadd.f32 %v334_v46, %v292_v40  ;;  %v350_v49 = vadd.f32 %v349_v43, %v348_v36  ;;  %v357_v50 = vadd.f32 %v356_v44, %v355_v37  ;;  %v364_v51 = vadd.f32 %v363_v45, %v362_v38 }
  0x93   : > { %v371_v52 = vadd.f32 %v370_v47, %v369_v39 }
  0x94   : > { %337 = vst [vmem:[%s974_s8] sm:$0xf] %v336_v48  ;;  %v376_v54 = vsel %vm329_vm1, %v357_v50, %v350_v49 }
  0x95   : > { %v377_v55 = vsel %vm331_vm2, %v364_v51, %v376_v54 }
  0x96   : > { %v378_v56 = vsel %vm333_vm3, %v371_v52, %v377_v55 }
  0x97   : > { %v380_v57 = vadd.f32 %v528_v53, %v378_v56 }
  0x99   : > { %529 = vst [vmem:[%s974_s8 + $0x4] sm:$0xf] %v380_v57 }
  0x9a   : > { %693 = shalt.err (!%p690_p11)
}
  0x9b   : > { %s694_s20 = scalar_lea.hbm %s1012_s30, 128  ;;  %s698_s29 = scalar_lea.hbm %s1066_s2, 256 }
  0x9c   : > { %p695_p1 = scmp.ne.s32.totalorder %s1012_s30, %s694_s20  ;;  %p699_p5 = scmp.lt.u32.totalorder %s1012_s30, %s1066_s2 }
  0x9d   : > { %p700_p4 = scmp.lt.u32.totalorder %s698_s29, %s694_s20  ;;  %p702_p0 = scmp.lt.u32.totalorder %s694_s20, %s1012_s30 }
  0x9e   : > { %p696_p6 = pnand %p695_p1, %p1077_p3 }
  0x9f   : > { %p701_p8 = por %p700_p4, %p699_p5 }
  0xa0   : > { %p697_p2 = pneg %p696_p6 }
  0xa1   : > { %p703_p12 = por %p702_p0, %p701_p8 }
  0xa3   : > { %p704_p13 = pnand %p703_p12, %p697_p2 }
  0xa5   : > { %707 = shalt.err (!%p704_p13)
}
  0xa6   : > { %s774_s7 = smov 64   ;;  %s775_s8 = smov 4  }
  0xa7   : > { %542 = dma.vmem_to_hbm [thread:$0]  (%p1077_p3), %s1014_s18, 128, %s1012_s30, %s383_s12, %s774_s7, %s774_s7, %s775_s8  }
  0xa8 PF: > { %s413_s21 = sand.u32 1, %s746_s9   ;;  %p1078_p7 = scmp.ne.s32.totalorder %s1072_s24, 0 }
  0xa9   : > { %p1079_p10 = scmp.ge.s32.totalorder %s766_s14, 2  ;;  %s414_s19 = scalar_lea.sflag [#allocation4], %s413_s21 }
  0xab   : > { %p552_p9 = pnand %p1079_p10, %p1078_p7 }
  0xad   : > { %741 = dma.done.wait (!%p552_p9), %s414_s19, 128  }
  0xae   : > { %743 = vsyncadd (!%p552_p9), %s414_s19, 4294967168  ;;  %s21_s14 = sadd.s32 1, %s766_s14   ;;  %s1080_s9 = smov %s750_s10 }
  0xaf   : > { %p18_p11 = scmp.ge.s32.totalorder %s21_s14, 4   ;;  %s1081_s10 = smov %s754_s11 }
  0xb0   : > { %s1082_s11 = smov %s847_s23  ;;  %s1083_s12 = smov %s762_s13 }
  0xb1   : > { %s1084_s13 = smov %s1086_s17  ;;  %20 = sbr.rel (!%p18_p11) target bundleno = 8 (0x8), region = 91 }
  0xb8   :  { %419 = vsyncpa [#allocation3], 1 }
  0xb9   :  { %421 = vsyncpa [#allocation3 + $0x1], 1 }
  0xba   :  { %422 = vsyncpa [#allocation6], 1 }
  0xbb   :  { %424 = vsyncpa [#allocation6 + $0x1], 1 }
  0xbc   :  { %425 = vsyncpa [#allocation4], 1 }
  0xbd   :  { %427 = vsyncpa [#allocation4 + $0x1], 1 }

</bundles_post_ra>
